<compile_context>
chip_gen: v7x
topology: tpu7x:2x2x1
jax: 0.10.0
libtpu: 0.0.40
codegen_flags: <defaults>
</compile_context>

<pallas_src>
import jax
import jax.numpy as jnp
from jax.experimental import pallas as pl
from jax.experimental.pallas import tpu as pltpu

_LANE = 128
_BLOCK_BYTES_TARGET = 4 * 1024 * 1024   # ~4 MiB x-block; 2*(in+out) dbl-buffered ~16 MiB
_VMEM_LIMIT_BYTES = 48 * 1024 * 1024    # explicit scoped VMEM; fits all of v5e/v6e/v7x


def _affine_kernel(x_ref, w_ref, b_ref, o_ref):
    # x_ref: (block_r, tile_s); w_ref/b_ref: (block_r, 1) f32, broadcast over lanes.
    x = x_ref[...].astype(jnp.float32)
    o_ref[...] = (x * w_ref[...] + b_ref[...]).astype(o_ref.dtype)


def _round_up(x, q):
    return ((x + q - 1) // q) * q


def _pick_tile(total, target, quantum):
    """Largest t <= target with t % quantum == 0 and total % t == 0.

    `total` is guaranteed (by padding) to be a multiple of `quantum`, so the
    search always terminates with at least `quantum` — no full-extent fallback.
    """
    t = min(max(target, quantum), total)
    t -= t % quantum
    while t > quantum:
        if total % t == 0:
            return t
        t -= quantum
    return quantum


def affine(x, weight, bias):
    """Per-channel affine: x * weight + bias.

    x:      (N, C, T, H, W)
    weight: (C, 1, 1, 1)
    bias:   (C, 1, 1, 1)
    """
    N, C, T, H, W = x.shape
    S = T * H * W
    R = N * C

    itemsize = jnp.dtype(x.dtype).itemsize
    sublane = {4: 8, 2: 16, 1: 32}.get(itemsize, 8)

    # Rows = (n, c) pairs (c fastest, matching x.reshape); cols = flat (t,h,w).
    x2 = x.reshape(R, S)

    # Pad to lane/sublane quanta so every block is full-width and unmasked.
    # Aligned shapes (the common case) skip the pad entirely at trace time.
    S_pad = _round_up(S, _LANE)
    R_pad = _round_up(R, sublane)
    if S_pad != S or R_pad != R:
        x2 = jnp.pad(x2, ((0, R_pad - R), (0, S_pad - S)))

    # Per-row scale/shift in f32 (matches PyTorch param precision). Tiny HBM cost.
    w_row = jnp.broadcast_to(weight.reshape(1, C), (N, C)).reshape(R, 1)
    b_row = jnp.broadcast_to(bias.reshape(1, C), (N, C)).reshape(R, 1)
    w_row = w_row.astype(jnp.float32)
    b_row = b_row.astype(jnp.float32)
    if R_pad != R:
        w_row = jnp.pad(w_row, ((0, R_pad - R), (0, 0)))
        b_row = jnp.pad(b_row, ((0, R_pad - R), (0, 0)))

    elems_budget = _BLOCK_BYTES_TARGET // itemsize

    if S_pad * sublane <= elems_budget:
        # Preferred path: full-S (contiguous HBM) tiles, 1-D grid over rows.
        tile_s = S_pad
        max_rows = (elems_budget // S_pad) // sublane * sublane
        block_r = _pick_tile(R_pad, max_rows, sublane)
        # v7x megacore guard: keep >= 2 row blocks when possible so both
        # TensorCores stream (no-op on single-core v5e/v6e).
        if R_pad // block_r < 2 and R_pad >= 2 * sublane:
            block_r = _pick_tile(R_pad, R_pad // 2, sublane)
        grid = (R_pad // block_r,)
        in_specs = [
            pl.BlockSpec((block_r, tile_s), lambda i: (i, 0)),
            pl.BlockSpec((block_r, 1), lambda i: (i, 0)),
            pl.BlockSpec((block_r, 1), lambda i: (i, 0)),
        ]
        out_spec = pl.BlockSpec((block_r, tile_s), lambda i: (i, 0))
        dim_sem = ("parallel",)
    else:
        # S alone exceeds the block budget: split the lane axis too. Row axis
        # leads (megacore-shardable); lane axis innermost so the w/b block
        # index is unchanged across j and is not re-DMA'd.
        block_r = sublane
        max_lanes = (elems_budget // block_r) // _LANE * _LANE
        tile_s = _pick_tile(S_pad, max_lanes, _LANE)
        grid = (R_pad // block_r, S_pad // tile_s)
        in_specs = [
            pl.BlockSpec((block_r, tile_s), lambda i, j: (i, j)),
            pl.BlockSpec((block_r, 1), lambda i, j: (i, 0)),
            pl.BlockSpec((block_r, 1), lambda i, j: (i, 0)),
        ]
        out_spec = pl.BlockSpec((block_r, tile_s), lambda i, j: (i, j))
        dim_sem = ("parallel", "parallel")

    cost = pl.CostEstimate(
        flops=2 * R * S,
        transcendentals=0,
        bytes_accessed=2 * R * S * itemsize + 2 * R * 4,
    )

    out2 = pl.pallas_call(
        _affine_kernel,
        out_shape=jax.ShapeDtypeStruct((R_pad, S_pad), x.dtype),
        grid_spec=pltpu.PrefetchScalarGridSpec(
            num_scalar_prefetch=0,
            grid=grid,
            in_specs=in_specs,
            out_specs=out_spec,
        ),
        compiler_params=pltpu.CompilerParams(
            dimension_semantics=dim_sem,
            vmem_limit_bytes=_VMEM_LIMIT_BYTES,
        ),
        cost_estimate=cost,
    )(x2, w_row, b_row)

    if S_pad != S or R_pad != R:
        out2 = out2[:R, :S]
    return out2.reshape(N, C, T, H, W)


if __name__ == "__main__":
    key = jax.random.PRNGKey(0)
    kx, kw, kb = jax.random.split(key, 3)

    # Small shapes consistent with the 3-D CNN usage: N=2, C=4, T=8, H=W=16.
    N, C, T, H, W = 2, 4, 8, 16, 16
    x = jax.random.normal(kx, (N, C, T, H, W), dtype=jnp.float32)
    weight = jax.random.normal(kw, (C, 1, 1, 1), dtype=jnp.float32)
    bias = jax.random.normal(kb, (C, 1, 1, 1), dtype=jnp.float32)

    y = affine(x, weight, bias)
    jax.block_until_ready(y)

    y_ref = x * weight[None, ...] + bias[None, ...]
    assert jnp.allclose(y, y_ref, atol=1e-6, rtol=1e-6), "f32 mismatch vs reference"

    # bf16 path (bf16 stays bf16 in HBM; f32 params in-kernel).
    x_bf16 = x.astype(jnp.bfloat16)
    y_bf16 = affine(x_bf16, weight, bias)
    jax.block_until_ready(y_bf16)
    y_bf16_ref = (x_bf16.astype(jnp.float32) * weight[None, ...]
                  + bias[None, ...]).astype(jnp.bfloat16)
    assert jnp.allclose(y_bf16.astype(jnp.float32),
                        y_bf16_ref.astype(jnp.float32),
                        atol=1e-2, rtol=1e-2), "bf16 mismatch vs reference"

    # Ragged-S path (7x7 spatial stage): S = 4*7*7 = 196 -> padded to 256.
    x7 = jax.random.normal(kx, (N, C, 4, 7, 7), dtype=jnp.float32)
    y7 = affine(x7, weight, bias)
    jax.block_until_ready(y7)
    y7_ref = x7 * weight[None, ...] + bias[None, ...]
    assert jnp.allclose(y7, y7_ref, atol=1e-6, rtol=1e-6), "ragged-S mismatch vs reference"

    print("KERNEL_OK")
</pallas_src>

<mosaic_0001>
module attributes {stable_mosaic.version = 11 : i64} {
  func.func @_affine_kernel(%arg0: i32, %arg1: memref<8x2048xf32, #tpu.memory_space<vmem>>, %arg2: memref<8x1xf32, #tpu.memory_space<vmem>>, %arg3: memref<8x1xf32, #tpu.memory_space<vmem>>, %arg4: memref<8x2048xf32, #tpu.memory_space<vmem>>) attributes {dimension_semantics = [#tpu.dimension_semantics<parallel>], iteration_bounds = array<i64: 1>, scalar_prefetch = 0 : i64, scratch_operands = 0 : i64, tpu.core_type = #tpu.core_type<tc>, window_params = [{transform_indices = @transform_0, window_bounds = array<i64: 8, 2048>}, {transform_indices = @transform_1, window_bounds = array<i64: 8, 1>}, {transform_indices = @transform_2, window_bounds = array<i64: 8, 1>}, {transform_indices = @transform_3, window_bounds = array<i64: 8, 2048>}]} {
    %c0 = arith.constant 0 : index
    %c0_0 = arith.constant 0 : index
    %0 = vector.load %arg1[%c0, %c0_0] : memref<8x2048xf32, #tpu.memory_space<vmem>>, vector<8x2048xf32>
    %c0_1 = arith.constant 0 : index
    %c0_2 = arith.constant 0 : index
    %1 = vector.load %arg2[%c0_1, %c0_2] : memref<8x1xf32, #tpu.memory_space<vmem>>, vector<8x1xf32>
    %2 = vector.broadcast %1 : vector<8x1xf32> to vector<8x2048xf32>
    %3 = arith.mulf %0, %2 : vector<8x2048xf32>
    %c0_3 = arith.constant 0 : index
    %c0_4 = arith.constant 0 : index
    %4 = vector.load %arg3[%c0_3, %c0_4] : memref<8x1xf32, #tpu.memory_space<vmem>>, vector<8x1xf32>
    %5 = vector.broadcast %4 : vector<8x1xf32> to vector<8x2048xf32>
    %6 = arith.addf %3, %5 : vector<8x2048xf32>
    %c0_5 = arith.constant 0 : index
    %c0_6 = arith.constant 0 : index
    %7 = vector.load %arg4[%c0_5, %c0_6] : memref<8x2048xf32, #tpu.memory_space<vmem>>, vector<8x2048xf32>
    tpu.vector_store %arg4[%c0_5, %c0_6], %6 {strides = array<i32>} : memref<8x2048xf32, #tpu.memory_space<vmem>>, vector<8x2048xf32>,
    return
  }
  func.func @transform_0(%arg0: i32) -> (i32, i32) {
    %c0_i32 = arith.constant 0 : i32
    %c0_i32_0 = arith.constant 0 : i32
    return %arg0, %c0_i32 : i32, i32
  }
  func.func @transform_1(%arg0: i32) -> (i32, i32) {
    %c0_i32 = arith.constant 0 : i32
    %c0_i32_0 = arith.constant 0 : i32
    return %arg0, %c0_i32 : i32, i32
  }
  func.func @transform_2(%arg0: i32) -> (i32, i32) {
    %c0_i32 = arith.constant 0 : i32
    %c0_i32_0 = arith.constant 0 : i32
    return %arg0, %c0_i32 : i32, i32
  }
  func.func @transform_3(%arg0: i32) -> (i32, i32) {
    %c0_i32 = arith.constant 0 : i32
    %c0_i32_0 = arith.constant 0 : i32
    return %arg0, %c0_i32 : i32, i32
  }
}

</mosaic_0001>

<bundles_post_ra>
// kernel: tpu_custom_call.1
= control target key start
LH: loop header
LB: loop body
LE: loop exit
PB: predicated region body
PF: predicated region fallthrough
CT: control target
= control target key end

     0   :  { %8 = vsyncpa [#allocation3], 0  ;;  %s223_s0 = inlined_call_operand.hbm [shape: f32[8,2048], index: 0, kind: input, shape index: {}]   ;;  %s224_s1 = inlined_call_operand.vmem [shape: f32[8,1], index: 1, kind: input, shape index: {}]   ;;  %s225_s2 = inlined_call_operand.vmem [shape: f32[8,1], index: 2, kind: input, shape index: {}]   ;;  %s226_s3 = inlined_call_operand.hbm [shape: f32[8,2048], index: 3, kind: output, shape index: {}]  }
   0x1   :  { %9 = vsyncpa [#allocation4], 0  ;;  %s170_s12 = smov [#allocation2]   ;;  %s122_s16 = scalar_lea.hbm %s223_s0, 2048 }
   0x2   :  { %s16_s13 = sshll.u32 %s170_s12, 4  ;;  %p123_p0 = scmp.ne.s32.totalorder %s223_s0, %s122_s16  ;;  %s17_s13 = int_to_ptr.vmem [resolvable:$true] %s16_s13 }
   0x3   :  { %p126_p1 = scmp.lt.u32.totalorder %s122_s16, %s223_s0 }
   0x5   :  { %p128_p2 = pnand %p126_p1, %p123_p0 }
   0x7   :  { %131 = shalt.err (!%p128_p2)
}
   0x8   :  { %s132_s21 = scalar_lea.vmem %s17_s13, 2048  ;;  %p137_p4 = scmp.lt.s32.totalorder %s17_s13, %s17_s13 }
   0x9   :  { %p133_p3 = scmp.ne.s32.totalorder %s17_s13, %s132_s21  ;;  %p138_p5 = scmp.lt.s32.totalorder %s132_s21, %s132_s21 }
   0xb   :  { %p139_p6 = por %p138_p5, %p137_p4 }
   0xd   :  { %p140_p7 = pnand %p139_p6, %p133_p3 }
   0xf   :  { %143 = shalt.err (!%p140_p7)
}
  0x10   :  { %19 = dma.hbm_to_vmem [thread:$0]  %s223_s0, 2048, %s17_s13, [#allocation3]  }
  0x11   :  { %166 = dma.done.wait [#allocation3], 2048  }
  0x12   :  { %167 = vsyncadd [#allocation3], 4294965248  ;;  %v171_v0 = vmov 0   ;;  %v43_v1 = vld [vmem:[%s224_s1] sm:$0xff]  ;;  %v28_v4 = vld [vmem:[#allocation2 + $0x8] sm:$0xff]  ;;  %s172_s0 = smov [#allocation5]  }
  0x13   :  { %121 = vset.pattern.permute.xlu0 %v171_v0  ;;  %v65_v2 = vld [vmem:[%s225_s2] sm:$0xff]  ;;  %v29_v5 = vld [vmem:[#allocation2 + $0x10] sm:$0xff]  ;;  %v30_v6 = vld [vmem:[#allocation2 + $0x18] sm:$0xff]  ;;  %s109_s1 = sshll.u32 %s172_s0, 4  ;;  %s110_s1 = int_to_ptr.vmem [resolvable:$true] %s109_s1 }
  0x14   :  { %46 = vperm.xlu0 %121, %v43_v1   ;;  %v27_v3 = vld [vmem:[#allocation2] sm:$0xff]  ;;  %v32_v8 = vld [vmem:[#allocation2 + $0x28] sm:$0xff]  ;;  %v33_v9 = vld [vmem:[#allocation2 + $0x30] sm:$0xff]  ;;  %s144_s2 = scalar_lea.vmem %s110_s1, 2048  ;;  %p149_p9 = scmp.lt.s32.totalorder %s110_s1, %s110_s1 }
  0x15   :  { %v31_v7 = vld [vmem:[#allocation2 + $0x20] sm:$0xff]  ;;  %v34_v10 = vld [vmem:[#allocation2 + $0x38] sm:$0xff]  ;;  %v36_v12 = vld [vmem:[#allocation2 + $0x48] sm:$0xff]  ;;  %p145_p8 = scmp.ne.s32.totalorder %s110_s1, %s144_s2  ;;  %p150_p10 = scmp.lt.s32.totalorder %s144_s2, %s144_s2 }
  0x16   :  { %v35_v11 = vld [vmem:[#allocation2 + $0x40] sm:$0xff]  ;;  %v37_v14 = vld [vmem:[#allocation2 + $0x50] sm:$0xff]  ;;  %v38_v15 = vld [vmem:[#allocation2 + $0x58] sm:$0xff] }
  0x17   :  { %v39_v16 = vld [vmem:[#allocation2 + $0x60] sm:$0xff]  ;;  %v40_v17 = vld [vmem:[#allocation2 + $0x68] sm:$0xff]  ;;  %v41_v18 = vld [vmem:[#allocation2 + $0x70] sm:$0xff]  ;;  %p151_p11 = por %p150_p10, %p149_p9 }
  0x18   :  { %68 = vperm.xlu0 %121, %v65_v2   ;;  %v42_v19 = vld [vmem:[#allocation2 + $0x78] sm:$0xff] }
  0x19   :  { %p152_p12 = pnand %p151_p11, %p145_p8 }
  0x93   :  { %v47_v13 = vpop.permute.xlu0 %46 }
  0x94   :  { %v49_v20 = vmul.f32 %v47_v13, %v27_v3  ;;  %v50_v21 = vmul.f32 %v47_v13, %v28_v4  ;;  %v51_v22 = vmul.f32 %v47_v13, %v29_v5  ;;  %v52_v23 = vmul.f32 %v47_v13, %v30_v6 }
  0x95   :  { %v53_v24 = vmul.f32 %v47_v13, %v31_v7  ;;  %v54_v25 = vmul.f32 %v47_v13, %v32_v8  ;;  %v55_v26 = vmul.f32 %v47_v13, %v33_v9  ;;  %v56_v27 = vmul.f32 %v47_v13, %v34_v10 }
  0x96   :  { %v57_v28 = vmul.f32 %v47_v13, %v35_v11  ;;  %v58_v29 = vmul.f32 %v47_v13, %v36_v12  ;;  %v59_v30 = vmul.f32 %v47_v13, %v37_v14  ;;  %v60_v31 = vmul.f32 %v47_v13, %v38_v15 }
  0x97   :  { %v69_v32 = vpop.permute.xlu0 %68  ;;  %v61_v33 = vmul.f32 %v47_v13, %v39_v16  ;;  %v62_v34 = vmul.f32 %v47_v13, %v40_v17  ;;  %v63_v35 = vmul.f32 %v47_v13, %v41_v18  ;;  %v64_v36 = vmul.f32 %v47_v13, %v42_v19 }
  0x98   :  { %v71_v37 = vadd.f32 %v69_v32, %v49_v20  ;;  %v72_v38 = vadd.f32 %v69_v32, %v50_v21  ;;  %v73_v39 = vadd.f32 %v69_v32, %v51_v22  ;;  %v74_v40 = vadd.f32 %v69_v32, %v52_v23 }
  0x99   :  { %v75_v41 = vadd.f32 %v69_v32, %v53_v24  ;;  %v76_v42 = vadd.f32 %v69_v32, %v54_v25  ;;  %v77_v43 = vadd.f32 %v69_v32, %v55_v26  ;;  %v78_v44 = vadd.f32 %v69_v32, %v56_v27 }
  0x9a   :  { %v79_v45 = vadd.f32 %v69_v32, %v57_v28  ;;  %v80_v46 = vadd.f32 %v69_v32, %v58_v29  ;;  %v81_v47 = vadd.f32 %v69_v32, %v59_v30  ;;  %v82_v48 = vadd.f32 %v69_v32, %v60_v31  ;;  %87 = vst [vmem:[#allocation5] sm:$0xff] %v71_v37 }
  0x9b   :  { %88 = vst [vmem:[#allocation5 + $0x8] sm:$0xff] %v72_v38  ;;  %89 = vst [vmem:[#allocation5 + $0x10] sm:$0xff] %v73_v39  ;;  %v83_v49 = vadd.f32 %v69_v32, %v61_v33  ;;  %v84_v50 = vadd.f32 %v69_v32, %v62_v34  ;;  %v85_v51 = vadd.f32 %v69_v32, %v63_v35 }
  0x9c   :  { %90 = vst [vmem:[#allocation5 + $0x18] sm:$0xff] %v74_v40  ;;  %v86_v52 = vadd.f32 %v69_v32, %v64_v36  ;;  %91 = vst [vmem:[#allocation5 + $0x20] sm:$0xff] %v75_v41 }
  0x9d   :  { %92 = vst [vmem:[#allocation5 + $0x28] sm:$0xff] %v76_v42  ;;  %93 = vst [vmem:[#allocation5 + $0x30] sm:$0xff] %v77_v43 }
  0x9e   :  { %94 = vst [vmem:[#allocation5 + $0x38] sm:$0xff] %v78_v44  ;;  %95 = vst [vmem:[#allocation5 + $0x40] sm:$0xff] %v79_v45 }
  0x9f   :  { %96 = vst [vmem:[#allocation5 + $0x48] sm:$0xff] %v80_v46  ;;  %97 = vst [vmem:[#allocation5 + $0x50] sm:$0xff] %v81_v47 }
  0xa0   :  { %98 = vst [vmem:[#allocation5 + $0x58] sm:$0xff] %v82_v48  ;;  %99 = vst [vmem:[#allocation5 + $0x60] sm:$0xff] %v83_v49 }
  0xa1   :  { %100 = vst [vmem:[#allocation5 + $0x68] sm:$0xff] %v84_v50  ;;  %101 = vst [vmem:[#allocation5 + $0x70] sm:$0xff] %v85_v51 }
  0xa2   :  { %102 = vst [vmem:[#allocation5 + $0x78] sm:$0xff] %v86_v52 }
  0xa3   :  { %155 = shalt.err (!%p152_p12)
}
  0xa4   :  { %s156_s30 = scalar_lea.hbm %s226_s3, 2048 }
  0xa5   :  { %p157_p13 = scmp.ne.s32.totalorder %s226_s3, %s156_s30  ;;  %p160_p0 = scmp.lt.u32.totalorder %s156_s30, %s226_s3 }
  0xa7   :  { %p162_p1 = pnand %p160_p0, %p157_p13 }
  0xa9   :  { %165 = shalt.err (!%p162_p1)
}
  0xaa   :  { %112 = dma.vmem_to_hbm [thread:$0]  %s110_s1, 2048, %s226_s3, [#allocation4]  }
  0xab   :  { %168 = dma.done.wait [#allocation4], 2048  }
  0xac   :  { %169 = vsyncadd [#allocation4], 4294965248 }
  0xad   :  { %116 = vsyncpa [#allocation3], 1 }
  0xae   :  { %117 = vsyncpa [#allocation4], 1 }

</bundles_post_ra>
